<compile_context>
chip_gen: v7x
topology: tpu7x:2x2x1
jax: 0.10.0
libtpu: 0.0.40
codegen_flags: <defaults>
</compile_context>

<pallas_src>
import jax
import jax.numpy as jnp
from jax.experimental import pallas as pl
from jax.experimental.pallas import tpu as pltpu


def _round_up(a, b):
    return ((a + b - 1) // b) * b


def _mlp_kernel(x_ref, wgu_ref, wd_ref, o_ref, acc_ref):
    # x_ref:   (tT, hd)       activation tile
    # wgu_ref: (hd, 2*tM)     fused [gate | up] weight slice for this m-tile, (in, out) layout
    # wd_ref:  (tM, hd)       down_proj weight slice, (in, out) layout
    # o_ref:   (tT, hd)       output tile (written on the last m step)
    # acc_ref: (tT, hd) f32   VMEM accumulator across the m (reduction) axis
    k = pl.program_id(1)

    @pl.when(k == 0)
    def _():
        acc_ref[...] = jnp.zeros_like(acc_ref)

    x = x_ref[...]

    # Fused gate+up projection: one MXU pass over the (hd, 2*tM) RHS.
    gu = jnp.dot(x, wgu_ref[...], preferred_element_type=jnp.float32)
    tm = wgu_ref.shape[1] // 2
    g = gu[:, :tm]
    u = gu[:, tm:]

    # SiLU(gate) * up in f32 (VPU + EUP).
    h = (g * jax.nn.sigmoid(g)) * u

    # Partial down-projection for this m-slice, accumulated in f32.
    # NOTE: h is cast to the weight dtype (bf16) before the MXU; tiny precision
    # difference vs an all-f32 reference (documented, acceptable for this module).
    acc_ref[...] += jnp.dot(h.astype(wd_ref.dtype), wd_ref[...],
                            preferred_element_type=jnp.float32)

    @pl.when(k == pl.num_programs(1) - 1)
    def _():
        o_ref[...] = acc_ref[...].astype(o_ref.dtype)


def prepare_mlp_weights(w_gate, w_up, w_down, *, m_tile=512):
    """One-time weight prep (model-load time, NOT per forward call).

    w_gate, w_up: (m, hd) in PyTorch nn.Linear layout; w_down: (hd, m).
    Returns (wgu, wd_t, tM):
      wgu : (hd, 2*m) fused [gate|up] weight, interleaved per m-tile so that
            columns [k*2*tM, (k+1)*2*tM) hold [gate tile k | up tile k].
      wd_t: (m, hd) down_proj weight in (in, out) layout.
    """
    m, hd = w_gate.shape
    tM = min(m_tile, m)
    assert m % tM == 0, f"m={m} must be a multiple of the m-tile {tM}"
    nk = m // tM
    wg_t = w_gate.T  # (hd, m)
    wu_t = w_up.T    # (hd, m)
    wgu = jnp.concatenate(
        [wg_t.reshape(hd, nk, tM), wu_t.reshape(hd, nk, tM)], axis=2
    ).reshape(hd, 2 * m)
    wd_t = w_down.T  # (m, hd)
    return wgu, wd_t, tM


def mlp_pallas(x, wgu, wd_t, m_tile, *, token_tile=256, vmem_limit_bytes=None):
    """x: (T, hd).  wgu: (hd, 2*m) fused weight.  wd_t: (m, hd)."""
    T, hd = x.shape
    m = wd_t.shape[0]
    tM = m_tile
    assert wgu.shape == (hd, 2 * m)
    assert m % tM == 0

    # Token tile: large for MXU utilization, clamped for small inputs, multiple of 8
    # (>=16 preferred for bf16 sublane packing at real token counts).
    tT = min(token_tile, _round_up(T, 8))
    T_pad = _round_up(T, tT)
    x_p = x if T_pad == T else jnp.pad(x, ((0, T_pad - T), (0, 0)))

    grid = (T_pad // tT, m // tM)

    xbytes = jnp.dtype(x.dtype).itemsize
    wbytes = jnp.dtype(wgu.dtype).itemsize
    if vmem_limit_bytes is None:
        tile_bytes = (tT * hd * xbytes            # x tile
                      + hd * 2 * tM * wbytes      # fused gate/up weight tile
                      + tM * hd * wbytes          # down_proj weight tile
                      + tT * hd * xbytes)         # output tile
        # 2x for double buffering + f32 accumulator + headroom; capped under
        # physical VMEM (re-derive smaller tiles for v7x's 64 MiB if needed).
        vmem_limit_bytes = min(max(2 * tile_bytes + tT * hd * 4 + (4 << 20),
                                   32 << 20),
                               112 << 20)

    cost = pl.CostEstimate(
        flops=2 * T * hd * m * 3,
        transcendentals=T * m,
        bytes_accessed=(wgu.size * wbytes + wd_t.size * wbytes
                        + T * hd * xbytes + T * hd * xbytes),
    )

    out = pl.pallas_call(
        _mlp_kernel,
        out_shape=jax.ShapeDtypeStruct((T_pad, hd), x.dtype),
        grid_spec=pltpu.PrefetchScalarGridSpec(
            num_scalar_prefetch=0,
            grid=grid,
            in_specs=[
                pl.BlockSpec((tT, hd), lambda i, k: (i, 0)),        # x: revisited across k
                pl.BlockSpec((hd, 2 * tM), lambda i, k: (0, k)),    # fused gate/up slice
                pl.BlockSpec((tM, hd), lambda i, k: (k, 0)),        # down_proj slice
            ],
            out_specs=pl.BlockSpec((tT, hd), lambda i, k: (i, 0)),  # accumulator output
            scratch_shapes=[pltpu.VMEM((tT, hd), jnp.float32)],
        ),
        compiler_params=pltpu.CompilerParams(
            dimension_semantics=("parallel", "arbitrary"),
            vmem_limit_bytes=int(vmem_limit_bytes),
        ),
        cost_estimate=cost,
    )(x_p, wgu, wd_t)

    return out if T_pad == T else out[:T]


def mlp_reference(x, w_gate, w_up, w_down):
    xf = x.astype(jnp.float32)
    g = xf @ w_gate.T.astype(jnp.float32)
    u = xf @ w_up.T.astype(jnp.float32)
    h = (g * jax.nn.sigmoid(g)) * u
    return (h @ w_down.T.astype(jnp.float32)).astype(x.dtype)


if __name__ == "__main__":
    # small shapes implied by the forward: batch=2, seq=8, hd=32, m=64
    batch, seq, hd, m = 2, 8, 32, 64
    dtype = jnp.bfloat16

    key = jax.random.PRNGKey(0)
    kx, kg, ku, kd = jax.random.split(key, 4)

    x = jax.random.normal(kx, (batch, seq, hd), dtype=jnp.float32).astype(dtype)
    # deterministic "dequantized" weights (PyTorch nn.Linear layout: (out, in))
    w_gate = (jax.random.normal(kg, (m, hd), dtype=jnp.float32) * 0.05).astype(dtype)
    w_up   = (jax.random.normal(ku, (m, hd), dtype=jnp.float32) * 0.05).astype(dtype)
    w_down = (jax.random.normal(kd, (hd, m), dtype=jnp.float32) * 0.05).astype(dtype)

    # one-time weight prep (would happen at model-load time)
    wgu, wd_t, m_tile = prepare_mlp_weights(w_gate, w_up, w_down, m_tile=512)

    x2d = x.reshape(batch * seq, hd)  # (tokens, hd)
    out = mlp_pallas(x2d, wgu, wd_t, m_tile, token_tile=256)
    out = jax.block_until_ready(out)

    ref = mlp_reference(x2d, w_gate, w_up, w_down)
    err = jnp.max(jnp.abs(out.astype(jnp.float32) - ref.astype(jnp.float32)))
    assert err < 1e-1, f"max abs error too large: {err}"

    out3d = out.reshape(batch, seq, hd)
    assert out3d.shape == (batch, seq, hd)
    print("KERNEL_OK")
</pallas_src>

<mosaic_0001>
module attributes {stable_mosaic.version = 11 : i64} {
  func.func @_mlp_kernel(%arg0: i32, %arg1: i32, %arg2: memref<16x32xbf16, #tpu.memory_space<vmem>>, %arg3: memref<32x128xbf16, #tpu.memory_space<vmem>>, %arg4: memref<64x32xbf16, #tpu.memory_space<vmem>>, %arg5: memref<16x32xbf16, #tpu.memory_space<vmem>>, %arg6: memref<16x32xf32, #tpu.memory_space<vmem>>) attributes {dimension_semantics = [#tpu.dimension_semantics<parallel>, #tpu.dimension_semantics<arbitrary>], iteration_bounds = array<i64: 1, 1>, scalar_prefetch = 0 : i64, scratch_operands = 1 : i64, tpu.core_type = #tpu.core_type<tc>, window_params = [{transform_indices = @transform_0, window_bounds = array<i64: 16, 32>}, {transform_indices = @transform_1, window_bounds = array<i64: 32, 128>}, {transform_indices = @transform_2, window_bounds = array<i64: 64, 32>}, {transform_indices = @transform_3, window_bounds = array<i64: 16, 32>}]} {
    %c0_i32 = arith.constant 0 : i32
    %0 = arith.cmpi eq, %arg1, %c0_i32 : i32
    %1 = arith.extui %0 : i1 to i32
    %c0_i32_0 = arith.constant 0 : i32
    %2 = arith.cmpi ne, %1, %c0_i32_0 : i32
    scf.if %2 {
      %cst_14 = arith.constant 0.000000e+00 : f32
      %24 = vector.broadcast %cst_14 : f32 to vector<16x32xf32>
      %c0_15 = arith.constant 0 : index
      %c0_16 = arith.constant 0 : index
      %25 = vector.load %arg6[%c0_15, %c0_16] : memref<16x32xf32, #tpu.memory_space<vmem>>, vector<16x32xf32>
      tpu.vector_store %arg6[%c0_15, %c0_16], %24 {strides = array<i32>} : memref<16x32xf32, #tpu.memory_space<vmem>>, vector<16x32xf32>,
    } else {
    }
    %c0 = arith.constant 0 : index
    %c0_1 = arith.constant 0 : index
    %3 = vector.load %arg2[%c0, %c0_1] : memref<16x32xbf16, #tpu.memory_space<vmem>>, vector<16x32xbf16>
    %c0_2 = arith.constant 0 : index
    %c0_3 = arith.constant 0 : index
    %4 = vector.load %arg3[%c0_2, %c0_3] : memref<32x128xbf16, #tpu.memory_space<vmem>>, vector<32x128xbf16>
    %cst = arith.constant dense<0.000000e+00> : vector<16x128xf32>
    %5 = tpu.matmul %3, %4, %cst {dimension_numbers = #tpu.dot_dimension_numbers<[1], [0], [0], [1], [0, 0, 1, 1], [], []>} : vector<16x32xbf16>, vector<32x128xbf16>, vector<16x128xf32> -> vector<16x128xf32>
    %6 = vector.extract_strided_slice %5 {offsets = [0, 0], sizes = [16, 64], strides = [1, 1]} : vector<16x128xf32> to vector<16x64xf32>
    %7 = vector.extract_strided_slice %5 {offsets = [0, 64], sizes = [16, 64], strides = [1, 1]} : vector<16x128xf32> to vector<16x64xf32>
    %8 = arith.negf %6 : vector<16x64xf32>
    %9 = math.exp %8 : vector<16x64xf32>
    %cst_4 = arith.constant 1.000000e+00 : f32
    %10 = vector.broadcast %cst_4 : f32 to vector<16x64xf32>
    %11 = arith.addf %10, %9 : vector<16x64xf32>
    %12 = arith.divf %10, %11 : vector<16x64xf32>
    %13 = arith.mulf %6, %12 : vector<16x64xf32>
    %14 = arith.mulf %13, %7 : vector<16x64xf32>
    %c0_5 = arith.constant 0 : index
    %c0_6 = arith.constant 0 : index
    %15 = vector.load %arg6[%c0_5, %c0_6] : memref<16x32xf32, #tpu.memory_space<vmem>>, vector<16x32xf32>
    %16 = arith.truncf %14 : vector<16x64xf32> to vector<16x64xbf16>
    %c0_7 = arith.constant 0 : index
    %c0_8 = arith.constant 0 : index
    %17 = vector.load %arg4[%c0_7, %c0_8] : memref<64x32xbf16, #tpu.memory_space<vmem>>, vector<64x32xbf16>
    %cst_9 = arith.constant dense<0.000000e+00> : vector<16x32xf32>
    %18 = tpu.matmul %16, %17, %cst_9 {dimension_numbers = #tpu.dot_dimension_numbers<[1], [0], [0], [1], [0, 0, 1, 1], [], []>} : vector<16x64xbf16>, vector<64x32xbf16>, vector<16x32xf32> -> vector<16x32xf32>
    %19 = arith.addf %15, %18 : vector<16x32xf32>
    %c0_10 = arith.constant 0 : index
    %c0_11 = arith.constant 0 : index
    %20 = vector.load %arg6[%c0_10, %c0_11] : memref<16x32xf32, #tpu.memory_space<vmem>>, vector<16x32xf32>
    tpu.vector_store %arg6[%c0_10, %c0_11], %19 {strides = array<i32>} : memref<16x32xf32, #tpu.memory_space<vmem>>, vector<16x32xf32>,
    %c0_i32_12 = arith.constant 0 : i32
    %21 = arith.cmpi eq, %arg1, %c0_i32_12 : i32
    %22 = arith.extui %21 : i1 to i32
    %c0_i32_13 = arith.constant 0 : i32
    %23 = arith.cmpi ne, %22, %c0_i32_13 : i32
    scf.if %23 {
      %c0_14 = arith.constant 0 : index
      %c0_15 = arith.constant 0 : index
      %24 = vector.load %arg6[%c0_14, %c0_15] : memref<16x32xf32, #tpu.memory_space<vmem>>, vector<16x32xf32>
      %25 = arith.truncf %24 : vector<16x32xf32> to vector<16x32xbf16>
      %c0_16 = arith.constant 0 : index
      %c0_17 = arith.constant 0 : index
      %26 = vector.load %arg5[%c0_16, %c0_17] : memref<16x32xbf16, #tpu.memory_space<vmem>>, vector<16x32xbf16>
      tpu.vector_store %arg5[%c0_16, %c0_17], %25 {strides = array<i32>} : memref<16x32xbf16, #tpu.memory_space<vmem>>, vector<16x32xbf16>,
    } else {
    }
    return
  }
  func.func @transform_0(%arg0: i32, %arg1: i32) -> (i32, i32) {
    %c0_i32 = arith.constant 0 : i32
    %c0_i32_0 = arith.constant 0 : i32
    return %arg0, %c0_i32 : i32, i32
  }
  func.func @transform_1(%arg0: i32, %arg1: i32) -> (i32, i32) {
    %c0_i32 = arith.constant 0 : i32
    %c0_i32_0 = arith.constant 0 : i32
    return %c0_i32, %arg1 : i32, i32
  }
  func.func @transform_2(%arg0: i32, %arg1: i32) -> (i32, i32) {
    %c0_i32 = arith.constant 0 : i32
    %c0_i32_0 = arith.constant 0 : i32
    return %arg1, %c0_i32 : i32, i32
  }
  func.func @transform_3(%arg0: i32, %arg1: i32) -> (i32, i32) {
    %c0_i32 = arith.constant 0 : i32
    %c0_i32_0 = arith.constant 0 : i32
    return %arg0, %c0_i32 : i32, i32
  }
}

</mosaic_0001>

<bundles_post_ra>
// kernel: tpu_custom_call.1
= control target key start
LH: loop header
LB: loop body
LE: loop exit
PB: predicated region body
PF: predicated region fallthrough
CT: control target
= control target key end

     0   :  { %v318_v1 = vmov 0.0   ;;  %vm319_vm0 = vmmov 0   ;;  %vm20_vm1 = vcmask 261120   ;;  %s385_s0 = inlined_call_operand.vmem [shape: bf16[16,32], index: 0, kind: input, shape index: {}]   ;;  %s386_s1 = inlined_call_operand.vmem [shape: bf16[32,128], index: 1, kind: input, shape index: {}]   ;;  %s387_s2 = inlined_call_operand.vmem [shape: bf16[64,32], index: 2, kind: input, shape index: {}]   ;;  %s388_s3 = inlined_call_operand.hbm [shape: bf16[16,32], index: 3, kind: output, shape index: {}]  }
   0x1   :  { %v279_v0 = vld [vmem:[%s386_s1] sm:$0xff]   ;;  %254 = vmatprep.subr.bf16.mxu0 %v318_v1  ;;  %262 = vmatprep.subr.bf16.mxu1 %v318_v1  ;;  %v280_v2 = vld [vmem:[%s386_s1 + $0x8] sm:$0xff]   ;;  %21 = vst.msk [vmem:[#allocation2] sm:$0xff] %vm20_vm1, %v318_v1  ;;  %22 = vst.msk [vmem:[#allocation2 + $0x8] sm:$0xff] %vm20_vm1, %v318_v1 }
   0x2   :  { %255 = vmatpush3.bf16.msra.mxu0 %v279_v0  ;;  %258 = vmatprep.mubr.msk.bf16.mxu0 %vm319_vm0, %v318_v1  ;;  %v281_v3 = vld [vmem:[%s385_s0] sm:$0xff]  }
   0x3   :  { %256 = vmatprep.subr.bf16.mxu0 %v318_v1  ;;  %270 = vmatprep.mubr.msk.bf16.mxu1 %vm319_vm0, %v318_v1 }
   0x4   :  { %8 = vsyncpa [#allocation4], 0  ;;  %v282_v4 = vld [vmem:[%s387_s2] sm:$0xff]   ;;  %v283_v5 = vld [vmem:[%s387_s2 + $0x8] sm:$0xff]   ;;  %s320_s24 = smov 64   ;;  %vm150_vm2 = vcmask 523264  }
   0x5   :  { %263 = vmatpush3.bf16.msra.mxu1 %v282_v4  ;;  %v284_v6 = vld [vmem:[%s387_s2 + $0x10] sm:$0xff]   ;;  %v285_v7 = vld [vmem:[%s387_s2 + $0x18] sm:$0xff]   ;;  %vm212_vm3 = vcmask 257024   ;;  %s321_s2 = smov [#allocation3]  }
   0x6   :  { %257 = vmatpush3.bf16.msra.mxu0 %v280_v2  ;;  %264 = vmatprep.subr.bf16.mxu1 %v318_v1  ;;  %s220_s25 = sshll.u32 %s321_s2, 4  ;;  %s221_s25 = int_to_ptr.vmem [resolvable:$true] %s220_s25 }
   0x7   :  { %s294_s26 = scalar_lea.vmem %s221_s25, 128  ;;  %p299_p1 = scmp.lt.s32.totalorder %s221_s25, %s221_s25 }
   0x8   :  { %v115_v27 = vld [vmem:[#allocation2] sm:$0xff]  ;;  %v116_v29 = vld [vmem:[#allocation2 + $0x8] sm:$0xff]  ;;  %p295_p0 = scmp.ne.s32.totalorder %s221_s25, %s294_s26  ;;  %p300_p2 = scmp.lt.s32.totalorder %s294_s26, %s294_s26 }
   0x9   :  { %259 = vmatmul.mubr.msk.bf16.vlgmr.msra.gmra.mrb[0].mxu0 %vm20_vm1, %v281_v3  ;;  %265 = vmatpush3.bf16.msra.mxu1 %v283_v5 }
   0xa   :  { %266 = vmatprep.subr.bf16.mxu1 %v318_v1  ;;  %p301_p3 = por %p300_p2, %p299_p1 }
   0xc   :  { %p302_p4 = pnand %p301_p3, %p295_p0 }
   0xd   :  { %267 = vmatpush3.bf16.msra.mxu1 %v284_v6 }
   0xe   :  { %268 = vmatprep.subr.bf16.mxu1 %v318_v1 }
  0x11   :  { %269 = vmatpush3.bf16.msra.mxu1 %v285_v7 }
  0xdc   :  { %v84_v8 = vpop.f32.mrb[0].mxu0 }
  0xdd   :  { %107 = vrot.lane.b32.xlu0 %v84_v8, %s320_s24  ;;  %v260_v9 = vpop.f32.mrb[1].mxu0  ;;  %v235_v12 = vmul.f32 -1.442695, %v84_v8 }
  0xde   :  { %v87_v10 = vpop.f32.mrb[2].mxu0 }
  0xdf   :  { %v261_v11 = vpop.f32.mrb[3].mxu0  ;;  %v236_v13 = vmul.f32 -1.442695, %v87_v10  ;;  %286 = vpow2.f32 %v235_v12 }
  0xe1   :  { %109 = vrot.lane.b32.xlu0 %v87_v10, %s320_s24  ;;  %288 = vpow2.f32 %v236_v13 }
  0xe9   :  { %v287_v14 = vpop.eup %286 }
  0xea   :  { %v97_v16 = vadd.f32 1.0, %v287_v14 }
  0xeb   :  { %v289_v15 = vpop.eup %288 }
  0xec   :  { %v98_v17 = vadd.f32 1.0, %v289_v15  ;;  %290 = vrcp.f32 %v97_v16 }
  0xee   :  { %292 = vrcp.f32 %v98_v17 }
  0xf6   :  { %v291_v18 = vpop.eup %290 }
  0xf7   :  { %v103_v21 = vmul.f32 %v291_v18, %v84_v8 }
  0xf8   :  { %v293_v19 = vpop.eup %292 }
  0xf9   :  { %v104_v22 = vmul.f32 %v293_v19, %v87_v10 }
 0x14f   :  { %v108_v20 = vpop.permute.xlu0 %107 }
 0x150   :  { %v113_v24 = vmul.f32 %v108_v20, %v103_v21 }
 0x153   :  { %v110_v23 = vpop.permute.xlu0 %109 }
 0x154   :  { %v114_v25 = vmul.f32 %v110_v23, %v104_v22 }
 0x156   :  { %v117_v26 = vpack.c.bf16 %v114_v25, %v113_v24 }
 0x158   :  { %271 = vmatmul.mubr.msk.bf16.vlgmr.msra.gmra.mrb[0].mxu1 %vm150_vm2, %v117_v26 }
 0x22b   :  { %v188_v28 = vpop.f32.mrb[0].mxu1 }
 0x22c   :  { %v195_v30 = vadd.f32 %v188_v28, %v115_v27  ;;  %v272_v31 = vpop.f32.mrb[1].mxu1 }
 0x22d   :  { %v191_v32 = vpop.f32.mrb[2].mxu1 }
 0x22e   :  { %197 = vst.msk [vmem:[#allocation2] sm:$0xff] %vm20_vm1, %v195_v30  ;;  %v196_v33 = vadd.f32 %v191_v32, %v116_v29  ;;  %v273_v34 = vpop.f32.mrb[3].mxu1 }
 0x230   :  { %198 = vst.msk [vmem:[#allocation2 + $0x8] sm:$0xff] %vm20_vm1, %v196_v33 }
 0x235   :  { %v202_v35 = vld [vmem:[#allocation2] sm:$0xff] }
 0x236   :  { %v244_v36 = vpack.c.bf16 %v202_v35, %v202_v35 }
 0x237   :  { %v203_v37 = vld [vmem:[#allocation2 + $0x8] sm:$0xff] }
 0x238   :  { %v245_v38 = vpack.c.bf16 %v203_v37, %v203_v37  ;;  %213 = vst.msk [vmem:[#allocation3] sm:$0xf] %vm212_vm3, %v244_v36 }
 0x23a   :  { %214 = vst.msk [vmem:[#allocation3 + $0x4] sm:$0xf] %vm212_vm3, %v245_v38 }
 0x23b   :  { %305 = shalt.err (!%p302_p4)
}
 0x23c   :  { %s306_s29 = scalar_lea.hbm %s388_s3, 128 }
 0x23d   :  { %p307_p5 = scmp.ne.s32.totalorder %s388_s3, %s306_s29  ;;  %p310_p6 = scmp.lt.u32.totalorder %s306_s29, %s388_s3 }
 0x23f   :  { %p312_p7 = pnand %p310_p6, %p307_p5 }
 0x241   :  { %315 = shalt.err (!%p312_p7)
}
 0x242   :  { %s322_s7 = smov 4  }
 0x243   :  { %226 = dma.vmem_to_hbm [thread:$0]  %s221_s25, 128, %s388_s3, [#allocation4], %s320_s24, %s320_s24, %s322_s7  }
 0x244   :  { %316 = dma.done.wait [#allocation4], 128  }
 0x245   :  { %317 = vsyncadd [#allocation4], 4294967168 }
 0x246   :  { %230 = vsyncpa [#allocation4], 1 }

</bundles_post_ra>
